<compile_context>
chip_gen: v7x
topology: tpu7x:2x2x1
jax: 0.10.0
libtpu: 0.0.40
codegen_flags: <defaults>
</compile_context>

<pallas_src>
import math

import jax
import jax.numpy as jnp
from jax import lax
from jax.experimental import pallas as pl
from jax.experimental.pallas import tpu as pltpu


# ----------------------------- Pallas kernel --------------------------------
def model_gt_kernel(feat_ref, cw_ref, peb_ref, g_ref, be_ref,
                    w1_ref, b1_ref, w2_ref, b2_ref, w3_ref, b3_ref, out_ref):
    # feat_ref: (S, blk, C_in) bf16     cw_ref:  (C_in, D) f32
    # peb_ref:  (S, 1, D) f32 (PE + conv bias)   g/be_ref: (1, 1, D) f32
    # w1_ref:   (S, D, H) f32   b1_ref: (1, H) f32
    # w2_ref:   (H, H) f32      b2_ref: (1, H) f32
    # w3_ref:   (H, O) f32      b3_ref: (1, O) f32
    # out_ref:  (blk, O) f32
    s, blk, c = feat_ref.shape
    d = cw_ref.shape[1]

    # 1x1 conv over channels as one big MXU matmul: M = S*blk, K = C_in, N = D.
    # (D on lanes -> good MXU column utilization; no per-sample loop, no (D,S).T)
    f = feat_ref[...].astype(jnp.float32).reshape(s * blk, c)
    h = jnp.dot(f, cw_ref[...], preferred_element_type=jnp.float32)   # (S*blk, D)
    h = h.reshape(s, blk, d) + peb_ref[...]                           # +bias +PE

    # Dropout(0.1) -> identity at inference.

    # LayerNorm over feature dim (biased variance, eps=1e-5 — PyTorch default).
    mu = jnp.mean(h, axis=-1, keepdims=True)
    var = jnp.mean((h - mu) * (h - mu), axis=-1, keepdims=True)
    hn = (h - mu) * lax.rsqrt(var + 1e-5) * g_ref[...] + be_ref[...]  # (S, blk, D)

    # reg_head layer 0 without the (S,D)->(S*D) flatten:
    #   y[b,h] = sum_s sum_d hn[s,b,d] * W1[s*D+d, h]   (W1 reshaped to (S,D,H))
    # -> batched matmul over S (standard (B,M,K)x(B,K,N) form) then reduce S.
    y1 = lax.dot_general(hn, w1_ref[...],
                         dimension_numbers=(((2,), (1,)), ((0,), (0,))),
                         preferred_element_type=jnp.float32)          # (S, blk, H)
    y = jnp.sum(y1, axis=0) + b1_ref[...]                             # (blk, H)
    y = jnp.maximum(y, 0.0)

    # reg_head layers 1 & 2.
    y = jnp.dot(y, w2_ref[...], preferred_element_type=jnp.float32) + b2_ref[...]
    y = jnp.maximum(y, 0.0)
    out_ref[...] = (jnp.dot(y, w3_ref[...], preferred_element_type=jnp.float32)
                    + b3_ref[...])


# ------------------------------ wrapper --------------------------------------
def model_gt_forward(feat_nchw, params, *, block_b=8):
    """feat_nchw: (B, C_in, H, W) float32 backbone feature map."""
    B, C_in, H, W = feat_nchw.shape
    S = H * W
    D = params["conv_w"].shape[1]
    Hd = params["w2"].shape[0]
    O = params["w3"].shape[1]
    assert params["w1"].shape[0] == S * D

    block_b = min(block_b, B)
    assert B % block_b == 0, "batch must be divisible by block_b"
    # (8,128) rule on the streamed block's sublane dim:
    assert block_b % 8 == 0 or block_b == B, "block_b must be a multiple of 8 or == B"

    # Seq-major layout (S, B, C): per-grid-step block is (S, block_b, C_in), the
    # conv flattens to (S*block_b, C_in) (free when block_b % 8 == 0) and the
    # reg_head contraction stays batched over S.  feat streamed as bf16.
    feat = jnp.transpose(feat_nchw.reshape(B, C_in, S), (2, 0, 1)).astype(jnp.bfloat16)

    # Fold the conv bias into the positional encoding (one resident operand less).
    pe_plus_b = (params["pe"] + params["conv_b"])[:, None, :]          # (S, 1, D)
    ln_g = params["ln_g"].reshape(1, 1, D)
    ln_b = params["ln_b"].reshape(1, 1, D)
    w1_3d = params["w1"].reshape(S, D, Hd)                             # row-major match

    args = (feat, params["conv_w"], pe_plus_b, ln_g, ln_b,
            w1_3d, params["b1"], params["w2"], params["b2"],
            params["w3"], params["b3"])

    def resident(shape):
        # Weight/PE/LN arrays: same block every grid step -> DMA'd once, stay in VMEM.
        # NOTE: could also be single-buffered (pipeline_mode) to reclaim VMEM on v7x.
        return pl.BlockSpec(shape, lambda i, _n=len(shape): (0,) * _n)

    in_specs = [
        pl.BlockSpec((S, block_b, C_in), lambda i: (0, i, 0)),         # streamed
        resident(params["conv_w"].shape), resident(pe_plus_b.shape),
        resident(ln_g.shape), resident(ln_b.shape),
        resident(w1_3d.shape), resident(params["b1"].shape),
        resident(params["w2"].shape), resident(params["b2"].shape),
        resident(params["w3"].shape), resident(params["b3"].shape),
    ]
    out_specs = pl.BlockSpec((block_b, O), lambda i: (i, 0))

    def nbytes(a):
        return int(a.size) * a.dtype.itemsize

    resident_bytes = sum(nbytes(a) for a in args[1:])
    stream_bytes = 2 * (S * block_b * C_in * 2 + block_b * O * 4)      # double-buffered
    needed = 2 * resident_bytes + stream_bytes + (4 << 20)
    # Cap at 56 MiB: leaves headroom on v7x (64 MiB physical); far above what these
    # shapes need on v5e/v6e (128 MiB physical).
    vmem_limit = int(max(32 << 20, min(needed, 56 << 20)))

    flops = 2 * B * S * C_in * D + 2 * B * (S * D * Hd + Hd * Hd + Hd * O)
    bytes_accessed = sum(nbytes(a) for a in args) + B * O * 4
    cost = pl.CostEstimate(flops=int(flops), transcendentals=int(B * S),
                           bytes_accessed=int(bytes_accessed))

    return pl.pallas_call(
        model_gt_kernel,
        out_shape=jax.ShapeDtypeStruct((B, O), jnp.float32),
        grid=(B // block_b,),
        in_specs=in_specs,
        out_specs=out_specs,
        compiler_params=pltpu.CompilerParams(
            dimension_semantics=("parallel",),      # v7x: shard batch over 2 TCs
            vmem_limit_bytes=vmem_limit),
        cost_estimate=cost,
    )(*args)


# --------------------------- parameter setup ---------------------------------
def make_params(key, c_in, seq_len, hidden, out_size):
    ks = jax.random.split(key, 4)

    def linear(k, fan_in, fan_out):
        bound = 1.0 / math.sqrt(fan_in)
        kw, kb = jax.random.split(k)
        w = jax.random.uniform(kw, (fan_in, fan_out), jnp.float32, -bound, bound)
        b = jax.random.uniform(kb, (1, fan_out), jnp.float32, -bound, bound)
        return w, b

    conv_w, conv_b = linear(ks[0], c_in, hidden)            # 1x1 conv as (C_in, D)
    w1, b1 = linear(ks[1], hidden * seq_len, hidden)        # reg_head layer 0
    w2, b2 = linear(ks[2], hidden, hidden)                  # reg_head layer 1
    w3, b3 = linear(ks[3], hidden, out_size)                # reg_head layer 2

    # standard sinusoidal positional encoding
    pos = jnp.arange(seq_len, dtype=jnp.float32)[:, None]
    div = jnp.exp(jnp.arange(0, hidden, 2, dtype=jnp.float32)
                  * (-math.log(10000.0) / hidden))
    pe = jnp.zeros((seq_len, hidden), jnp.float32)
    pe = pe.at[:, 0::2].set(jnp.sin(pos * div))
    pe = pe.at[:, 1::2].set(jnp.cos(pos * div))

    return dict(conv_w=conv_w, conv_b=conv_b, pe=pe,
                ln_g=jnp.ones((1, hidden), jnp.float32),
                ln_b=jnp.zeros((1, hidden), jnp.float32),
                w1=w1, b1=b1, w2=w2, b2=b2, w3=w3, b3=b3)


# pure-JAX reference (same bf16-feature-stream / f32-matmul numerics)
def reference(feat_nchw, p):
    B, C, H, W = feat_nchw.shape
    x = jnp.transpose(feat_nchw.reshape(B, C, H * W), (0, 2, 1))       # (B,S,C)
    x = x.astype(jnp.bfloat16).astype(jnp.float32)                     # match kernel stream
    h = jnp.einsum("bsc,cd->bsd", x, p["conv_w"],
                   preferred_element_type=jnp.float32) + p["conv_b"][0]
    h = h + p["pe"][None]
    m = h.mean(-1, keepdims=True)
    v = ((h - m) ** 2).mean(-1, keepdims=True)
    h = (h - m) * lax.rsqrt(v + 1e-5) * p["ln_g"][0] + p["ln_b"][0]
    flat = h.reshape(B, -1)
    y = jnp.maximum(flat @ p["w1"] + p["b1"][0], 0.0)
    y = jnp.maximum(y @ p["w2"] + p["b2"][0], 0.0)
    return y @ p["w3"] + p["b3"][0]


if __name__ == "__main__":
    # small shapes consistent with the module: C_IN stands in for 2048 (resnet50
    # trunk channels), S = H*W stands in for 49, HIDDEN stands in for 192.
    B, C_IN, H, W = 2, 64, 4, 4
    HIDDEN, OUT = 32, 2
    SEQ = H * W

    key = jax.random.PRNGKey(0)
    k_feat, k_par = jax.random.split(key)
    feat = jax.random.normal(k_feat, (B, C_IN, H, W), jnp.float32)
    params = make_params(k_par, C_IN, SEQ, HIDDEN, OUT)

    out = jax.block_until_ready(model_gt_forward(feat, params, block_b=8))
    ref = jax.block_until_ready(reference(feat, params))
    assert out.shape == (B, OUT), out.shape
    assert jnp.allclose(out, ref, rtol=1e-2, atol=1e-2), (out, ref)
    print("KERNEL_OK")
</pallas_src>

<mosaic_0001>
module attributes {stable_mosaic.version = 11 : i64} {
  func.func @model_gt_kernel(%arg0: i32, %arg1: memref<16x2x64xbf16, #tpu.memory_space<vmem>>, %arg2: memref<64x32xf32, #tpu.memory_space<vmem>>, %arg3: memref<16x1x32xf32, #tpu.memory_space<vmem>>, %arg4: memref<1x1x32xf32, #tpu.memory_space<vmem>>, %arg5: memref<1x1x32xf32, #tpu.memory_space<vmem>>, %arg6: memref<16x32x32xf32, #tpu.memory_space<vmem>>, %arg7: memref<1x32xf32, #tpu.memory_space<vmem>>, %arg8: memref<32x32xf32, #tpu.memory_space<vmem>>, %arg9: memref<1x32xf32, #tpu.memory_space<vmem>>, %arg10: memref<32x2xf32, #tpu.memory_space<vmem>>, %arg11: memref<1x2xf32, #tpu.memory_space<vmem>>, %arg12: memref<2x2xf32, #tpu.memory_space<vmem>>) attributes {dimension_semantics = [#tpu.dimension_semantics<parallel>], iteration_bounds = array<i64: 1>, scalar_prefetch = 0 : i64, scratch_operands = 0 : i64, tpu.core_type = #tpu.core_type<tc>, window_params = [{transform_indices = @transform_0, window_bounds = array<i64: 16, 2, 64>}, {pipeline_mode = #tpu.pipeline_mode<synchronous>, transform_indices = @transform_1, window_bounds = array<i64: 64, 32>}, {pipeline_mode = #tpu.pipeline_mode<synchronous>, transform_indices = @transform_2, window_bounds = array<i64: 16, 1, 32>}, {pipeline_mode = #tpu.pipeline_mode<synchronous>, transform_indices = @transform_3, window_bounds = array<i64: 1, 1, 32>}, {pipeline_mode = #tpu.pipeline_mode<synchronous>, transform_indices = @transform_4, window_bounds = array<i64: 1, 1, 32>}, {pipeline_mode = #tpu.pipeline_mode<synchronous>, transform_indices = @transform_5, window_bounds = array<i64: 16, 32, 32>}, {pipeline_mode = #tpu.pipeline_mode<synchronous>, transform_indices = @transform_6, window_bounds = array<i64: 1, 32>}, {pipeline_mode = #tpu.pipeline_mode<synchronous>, transform_indices = @transform_7, window_bounds = array<i64: 32, 32>}, {pipeline_mode = #tpu.pipeline_mode<synchronous>, transform_indices = @transform_8, window_bounds = array<i64: 1, 32>}, {pipeline_mode = #tpu.pipeline_mode<synchronous>, transform_indices = @transform_9, window_bounds = array<i64: 32, 2>}, {pipeline_mode = #tpu.pipeline_mode<synchronous>, transform_indices = @transform_10, window_bounds = array<i64: 1, 2>}, {transform_indices = @transform_11, window_bounds = array<i64: 2, 2>}]} {
    %c0 = arith.constant 0 : index
    %c0_0 = arith.constant 0 : index
    %c0_1 = arith.constant 0 : index
    %0 = vector.load %arg1[%c0, %c0_0, %c0_1] : memref<16x2x64xbf16, #tpu.memory_space<vmem>>, vector<16x2x64xbf16>
    %1 = arith.extf %0 : vector<16x2x64xbf16> to vector<16x2x64xf32>
    %2 = vector.shape_cast %1 : vector<16x2x64xf32> to vector<32x64xf32>
    %c0_2 = arith.constant 0 : index
    %c0_3 = arith.constant 0 : index
    %3 = vector.load %arg2[%c0_2, %c0_3] : memref<64x32xf32, #tpu.memory_space<vmem>>, vector<64x32xf32>
    %cst = arith.constant dense<0.000000e+00> : vector<32x32xf32>
    %4 = tpu.matmul %2, %3, %cst {dimension_numbers = #tpu.dot_dimension_numbers<[1], [0], [0], [1], [0, 0, 1, 1], [], []>} : vector<32x64xf32>, vector<64x32xf32>, vector<32x32xf32> -> vector<32x32xf32>
    %5 = vector.shape_cast %4 : vector<32x32xf32> to vector<16x2x32xf32>
    %c0_4 = arith.constant 0 : index
    %c0_5 = arith.constant 0 : index
    %c0_6 = arith.constant 0 : index
    %6 = vector.load %arg3[%c0_4, %c0_5, %c0_6] : memref<16x1x32xf32, #tpu.memory_space<vmem>>, vector<16x1x32xf32>
    %7 = vector.broadcast %6 : vector<16x1x32xf32> to vector<16x2x32xf32>
    %8 = arith.addf %5, %7 : vector<16x2x32xf32>
    %cst_7 = arith.constant dense<0.000000e+00> : vector<16x2xf32>
    %9 = vector.multi_reduction <add>, %8, %cst_7 [2] : vector<16x2x32xf32> to vector<16x2xf32>
    %10 = vector.shape_cast %9 : vector<16x2xf32> to vector<16x2x1xf32>
    %cst_8 = arith.constant 3.200000e+01 : f32
    %11 = vector.broadcast %cst_8 : f32 to vector<16x2x1xf32>
    %12 = arith.divf %10, %11 : vector<16x2x1xf32>
    %13 = vector.broadcast %12 : vector<16x2x1xf32> to vector<16x2x32xf32>
    %14 = arith.subf %8, %13 : vector<16x2x32xf32>
    %15 = vector.broadcast %12 : vector<16x2x1xf32> to vector<16x2x32xf32>
    %16 = arith.subf %8, %15 : vector<16x2x32xf32>
    %17 = arith.mulf %14, %16 : vector<16x2x32xf32>
    %cst_9 = arith.constant dense<0.000000e+00> : vector<16x2xf32>
    %18 = vector.multi_reduction <add>, %17, %cst_9 [2] : vector<16x2x32xf32> to vector<16x2xf32>
    %19 = vector.shape_cast %18 : vector<16x2xf32> to vector<16x2x1xf32>
    %cst_10 = arith.constant 3.200000e+01 : f32
    %20 = vector.broadcast %cst_10 : f32 to vector<16x2x1xf32>
    %21 = arith.divf %19, %20 : vector<16x2x1xf32>
    %22 = vector.broadcast %12 : vector<16x2x1xf32> to vector<16x2x32xf32>
    %23 = arith.subf %8, %22 : vector<16x2x32xf32>
    %cst_11 = arith.constant 9.99999974E-6 : f32
    %24 = vector.broadcast %cst_11 : f32 to vector<16x2x1xf32>
    %25 = arith.addf %21, %24 : vector<16x2x1xf32>
    %26 = math.rsqrt %25 : vector<16x2x1xf32>
    %27 = vector.broadcast %26 : vector<16x2x1xf32> to vector<16x2x32xf32>
    %28 = arith.mulf %23, %27 : vector<16x2x32xf32>
    %c0_12 = arith.constant 0 : index
    %c0_13 = arith.constant 0 : index
    %c0_14 = arith.constant 0 : index
    %29 = vector.load %arg4[%c0_12, %c0_13, %c0_14] : memref<1x1x32xf32, #tpu.memory_space<vmem>>, vector<1x1x32xf32>
    %30 = vector.broadcast %29 : vector<1x1x32xf32> to vector<16x2x32xf32>
    %31 = arith.mulf %28, %30 : vector<16x2x32xf32>
    %c0_15 = arith.constant 0 : index
    %c0_16 = arith.constant 0 : index
    %c0_17 = arith.constant 0 : index
    %32 = vector.load %arg5[%c0_15, %c0_16, %c0_17] : memref<1x1x32xf32, #tpu.memory_space<vmem>>, vector<1x1x32xf32>
    %33 = vector.broadcast %32 : vector<1x1x32xf32> to vector<16x2x32xf32>
    %34 = arith.addf %31, %33 : vector<16x2x32xf32>
    %c0_18 = arith.constant 0 : index
    %c0_19 = arith.constant 0 : index
    %c0_20 = arith.constant 0 : index
    %35 = vector.load %arg6[%c0_18, %c0_19, %c0_20] : memref<16x32x32xf32, #tpu.memory_space<vmem>>, vector<16x32x32xf32>
    %cst_21 = arith.constant dense<0.000000e+00> : vector<16x2x32xf32>
    %36 = tpu.matmul %34, %35, %cst_21 {dimension_numbers = #tpu.dot_dimension_numbers<[2], [1], [1], [2], [0, 0, 0, 1, 1, 2], [0], [0]>} : vector<16x2x32xf32>, vector<16x32x32xf32>, vector<16x2x32xf32> -> vector<16x2x32xf32>
    %cst_22 = arith.constant dense<0.000000e+00> : vector<2x32xf32>
    %37 = vector.multi_reduction <add>, %36, %cst_22 [0] : vector<16x2x32xf32> to vector<2x32xf32>
    %c0_23 = arith.constant 0 : index
    %c0_24 = arith.constant 0 : index
    %38 = vector.load %arg7[%c0_23, %c0_24] : memref<1x32xf32, #tpu.memory_space<vmem>>, vector<1x32xf32>
    %39 = vector.broadcast %38 : vector<1x32xf32> to vector<2x32xf32>
    %40 = arith.addf %37, %39 : vector<2x32xf32>
    %cst_25 = arith.constant 0.000000e+00 : f32
    %41 = vector.broadcast %cst_25 : f32 to vector<2x32xf32>
    %42 = arith.maximumf %40, %41 : vector<2x32xf32>
    %c0_26 = arith.constant 0 : index
    %c0_27 = arith.constant 0 : index
    %43 = vector.load %arg8[%c0_26, %c0_27] : memref<32x32xf32, #tpu.memory_space<vmem>>, vector<32x32xf32>
    %cst_28 = arith.constant dense<0.000000e+00> : vector<2x32xf32>
    %44 = tpu.matmul %42, %43, %cst_28 {dimension_numbers = #tpu.dot_dimension_numbers<[1], [0], [0], [1], [0, 0, 1, 1], [], []>} : vector<2x32xf32>, vector<32x32xf32>, vector<2x32xf32> -> vector<2x32xf32>
    %c0_29 = arith.constant 0 : index
    %c0_30 = arith.constant 0 : index
    %45 = vector.load %arg9[%c0_29, %c0_30] : memref<1x32xf32, #tpu.memory_space<vmem>>, vector<1x32xf32>
    %46 = vector.broadcast %45 : vector<1x32xf32> to vector<2x32xf32>
    %47 = arith.addf %44, %46 : vector<2x32xf32>
    %cst_31 = arith.constant 0.000000e+00 : f32
    %48 = vector.broadcast %cst_31 : f32 to vector<2x32xf32>
    %49 = arith.maximumf %47, %48 : vector<2x32xf32>
    %c0_32 = arith.constant 0 : index
    %c0_33 = arith.constant 0 : index
    %50 = vector.load %arg10[%c0_32, %c0_33] : memref<32x2xf32, #tpu.memory_space<vmem>>, vector<32x2xf32>
    %cst_34 = arith.constant dense<0.000000e+00> : vector<2x2xf32>
    %51 = tpu.matmul %49, %50, %cst_34 {dimension_numbers = #tpu.dot_dimension_numbers<[1], [0], [0], [1], [0, 0, 1, 1], [], []>} : vector<2x32xf32>, vector<32x2xf32>, vector<2x2xf32> -> vector<2x2xf32>
    %c0_35 = arith.constant 0 : index
    %c0_36 = arith.constant 0 : index
    %52 = vector.load %arg11[%c0_35, %c0_36] : memref<1x2xf32, #tpu.memory_space<vmem>>, vector<1x2xf32>
    %53 = vector.broadcast %52 : vector<1x2xf32> to vector<2x2xf32>
    %54 = arith.addf %51, %53 : vector<2x2xf32>
    %c0_37 = arith.constant 0 : index
    %c0_38 = arith.constant 0 : index
    %55 = vector.load %arg12[%c0_37, %c0_38] : memref<2x2xf32, #tpu.memory_space<vmem>>, vector<2x2xf32>
    tpu.vector_store %arg12[%c0_37, %c0_38], %54 {strides = array<i32>} : memref<2x2xf32, #tpu.memory_space<vmem>>, vector<2x2xf32>,
    return
  }
  func.func @transform_0(%arg0: i32) -> (i32, i32, i32) {
    %c0_i32 = arith.constant 0 : i32
    %c0_i32_0 = arith.constant 0 : i32
    %c0_i32_1 = arith.constant 0 : i32
    return %c0_i32, %arg0, %c0_i32_0 : i32, i32, i32
  }
  func.func @transform_1(%arg0: i32) -> (i32, i32) {
    %c0_i32 = arith.constant 0 : i32
    %c0_i32_0 = arith.constant 0 : i32
    %c0_i32_1 = arith.constant 0 : i32
    return %c0_i32, %c0_i32_0 : i32, i32
  }
  func.func @transform_2(%arg0: i32) -> (i32, i32, i32) {
    %c0_i32 = arith.constant 0 : i32
    %c0_i32_0 = arith.constant 0 : i32
    %c0_i32_1 = arith.constant 0 : i32
    %c0_i32_2 = arith.constant 0 : i32
    return %c0_i32, %c0_i32_0, %c0_i32_1 : i32, i32, i32
  }
  func.func @transform_3(%arg0: i32) -> (i32, i32, i32) {
    %c0_i32 = arith.constant 0 : i32
    %c0_i32_0 = arith.constant 0 : i32
    %c0_i32_1 = arith.constant 0 : i32
    %c0_i32_2 = arith.constant 0 : i32
    return %c0_i32, %c0_i32_0, %c0_i32_1 : i32, i32, i32
  }
  func.func @transform_4(%arg0: i32) -> (i32, i32, i32) {
    %c0_i32 = arith.constant 0 : i32
    %c0_i32_0 = arith.constant 0 : i32
    %c0_i32_1 = arith.constant 0 : i32
    %c0_i32_2 = arith.constant 0 : i32
    return %c0_i32, %c0_i32_0, %c0_i32_1 : i32, i32, i32
  }
  func.func @transform_5(%arg0: i32) -> (i32, i32, i32) {
    %c0_i32 = arith.constant 0 : i32
    %c0_i32_0 = arith.constant 0 : i32
    %c0_i32_1 = arith.constant 0 : i32
    %c0_i32_2 = arith.constant 0 : i32
    return %c0_i32, %c0_i32_0, %c0_i32_1 : i32, i32, i32
  }
  func.func @transform_6(%arg0: i32) -> (i32, i32) {
    %c0_i32 = arith.constant 0 : i32
    %c0_i32_0 = arith.constant 0 : i32
    %c0_i32_1 = arith.constant 0 : i32
    return %c0_i32, %c0_i32_0 : i32, i32
  }
  func.func @transform_7(%arg0: i32) -> (i32, i32) {
    %c0_i32 = arith.constant 0 : i32
    %c0_i32_0 = arith.constant 0 : i32
    %c0_i32_1 = arith.constant 0 : i32
    return %c0_i32, %c0_i32_0 : i32, i32
  }
  func.func @transform_8(%arg0: i32) -> (i32, i32) {
    %c0_i32 = arith.constant 0 : i32
    %c0_i32_0 = arith.constant 0 : i32
    %c0_i32_1 = arith.constant 0 : i32
    return %c0_i32, %c0_i32_0 : i32, i32
  }
  func.func @transform_9(%arg0: i32) -> (i32, i32) {
    %c0_i32 = arith.constant 0 : i32
    %c0_i32_0 = arith.constant 0 : i32
    %c0_i32_1 = arith.constant 0 : i32
    return %c0_i32, %c0_i32_0 : i32, i32
  }
  func.func @transform_10(%arg0: i32) -> (i32, i32) {
    %c0_i32 = arith.constant 0 : i32
    %c0_i32_0 = arith.constant 0 : i32
    %c0_i32_1 = arith.constant 0 : i32
    return %c0_i32, %c0_i32_0 : i32, i32
  }
  func.func @transform_11(%arg0: i32) -> (i32, i32) {
    %c0_i32 = arith.constant 0 : i32
    %c0_i32_0 = arith.constant 0 : i32
    return %arg0, %c0_i32 : i32, i32
  }
}

</mosaic_0001>

<bundles_post_ra>
// kernel: tpu_custom_call.1
= control target key start
LH: loop header
LB: loop body
LE: loop exit
PB: predicated region body
PF: predicated region fallthrough
CT: control target
= control target key end

     0   :  { %16 = vsyncpa [#allocation3], 0  ;;  %s3379_s0 = inlined_call_operand.vmem [shape: bf16[16,2,64], index: 0, kind: input, shape index: {}]   ;;  %s3380_s1 = inlined_call_operand.vmem [shape: f32[64,32], index: 1, kind: input, shape index: {}]   ;;  %s3381_s2 = inlined_call_operand.vmem [shape: f32[16,1,32], index: 2, kind: input, shape index: {}]   ;;  %s3382_s3 = inlined_call_operand.vmem [shape: f32[1,1,32], index: 3, kind: input, shape index: {}]   ;;  %s3383_s4 = inlined_call_operand.vmem [shape: f32[1,1,32], index: 4, kind: input, shape index: {}]   ;;  %s3384_s5 = inlined_call_operand.hbm [shape: f32[16,32,32], index: 5, kind: input, shape index: {}]   ;;  %s3385_s6 = inlined_call_operand.vmem [shape: f32[1,32], index: 6, kind: input, shape index: {}]   ;;  %s3386_s7 = inlined_call_operand.vmem [shape: f32[32,32], index: 7, kind: input, shape index: {}]   ;;  %s3387_s8 = inlined_call_operand.vmem [shape: f32[1,32], index: 8, kind: input, shape index: {}]   ;;  %s3388_s9 = inlined_call_operand.vmem [shape: f32[32,2], index: 9, kind: input, shape index: {}]   ;;  %s3389_s10 = inlined_call_operand.vmem [shape: f32[1,2], index: 10, kind: input, shape index: {}]   ;;  %s3390_s11 = inlined_call_operand.hbm [shape: f32[2,2], index: 11, kind: output, shape index: {}]  }
   0x1   :  { %17 = vsyncpa [#allocation4], 0  ;;  %s2779_s17 = smov [#allocation2]   ;;  %s2731_s21 = scalar_lea.hbm %s3384_s5, 8192 }
   0x2   :  { %s33_s18 = sshll.u32 %s2779_s17, 4  ;;  %p2732_p0 = scmp.ne.s32.totalorder %s3384_s5, %s2731_s21  ;;  %s34_s18 = int_to_ptr.vmem [resolvable:$true] %s33_s18 }
   0x3   :  { %p2735_p1 = scmp.lt.u32.totalorder %s2731_s21, %s3384_s5 }
   0x5   :  { %p2737_p2 = pnand %p2735_p1, %p2732_p0 }
   0x7   :  { %2740 = shalt.err (!%p2737_p2)
}
   0x8   :  { %s2741_s26 = scalar_lea.vmem %s34_s18, 8192  ;;  %p2746_p4 = scmp.lt.s32.totalorder %s34_s18, %s34_s18 }
   0x9   :  { %p2742_p3 = scmp.ne.s32.totalorder %s34_s18, %s2741_s26  ;;  %p2747_p5 = scmp.lt.s32.totalorder %s2741_s26, %s2741_s26 }
   0xb   :  { %p2748_p6 = por %p2747_p5, %p2746_p4 }
   0xd   :  { %p2749_p7 = pnand %p2748_p6, %p2742_p3 }
   0xf   :  { %2752 = shalt.err (!%p2749_p7)
}
  0x10   :  { %s2780_s27 = smov 128   ;;  %s2781_s28 = smov 8  }
  0x11   :  { %39 = dma.hbm_to_vmem [thread:$0]  %s3384_s5, 8192, %s34_s18, [#allocation3], %s2780_s27, %s2780_s27, %s2781_s28  }
  0x12   :  { %2775 = dma.done.wait [#allocation3], 8192  }
  0x13   :  { %2776 = vsyncadd [#allocation3], 4294959104  ;;  %v2782_v0 = vmov 1983009808   ;;  %v114_v2 = vlaneseq  ;;  %v85_v3 = vld [vmem:[%s3380_s1] sm:$0xff]  ;;  %v86_v4 = vld [vmem:[%s3380_s1 + $0x8] sm:$0xff] }
  0x14   :  { %v112_v1 = vunpack.c.l.s4 %v2782_v0  ;;  %v87_v5 = vld [vmem:[%s3380_s1 + $0x10] sm:$0xff]  ;;  %v2567_v8 = vpack.c.bf16 %v86_v4, %v85_v3  ;;  %v88_v9 = vld [vmem:[%s3380_s1 + $0x18] sm:$0xff]  ;;  %v89_v11 = vld [vmem:[%s3380_s1 + $0x20] sm:$0xff]  ;;  %vm177_vm0 = vcmask 523264   ;;  %vm487_vm1 = vcmask 254976   ;;  %s2786_s25 = smov [#allocation5]  }
  0x15   :  { %v115_v7 = vshrl.u32 %v114_v2, 7  ;;  %v2571_v10 = vpack.c.bf16 %v88_v9, %v87_v5  ;;  %v90_v12 = vld [vmem:[%s3380_s1 + $0x28] sm:$0xff]  ;;  %v53_v13 = vld [vmem:[%s3379_s0] sm:$0x1]  ;;  %v54_v14 = vld [vmem:[%s3379_s0 + $0x1] sm:$0x1] }
  0x16   :  { %v113_v6 = vunpack.c.0.s8 %v112_v1  ;;  %2568 = vmatprep.subr.bf16.mxu0 %v2567_v8  ;;  %v55_v15 = vld [vmem:[%s3379_s0 + $0x2] sm:$0x1]  ;;  %v56_v16 = vld [vmem:[%s3379_s0 + $0x3] sm:$0x1]  ;;  %v69_v17 = vunpack.c.l.bf16 %v53_v13  ;;  %v91_v18 = vld [vmem:[%s3380_s1 + $0x30] sm:$0xff]  ;;  %v70_v20 = vunpack.c.l.bf16 %v54_v14  ;;  %v2575_v27 = vpack.c.bf16 %v90_v12, %v89_v11 }
  0x17   :  { %2570 = vmatpush3.bf16.msra.mxu0 %v2567_v8  ;;  %v92_v19 = vld [vmem:[%s3380_s1 + $0x38] sm:$0xff]  ;;  %v71_v21 = vunpack.c.l.bf16 %v55_v15  ;;  %v72_v22 = vunpack.c.l.bf16 %v56_v16  ;;  %v57_v24 = vld [vmem:[%s3379_s0 + $0x4] sm:$0x1]  ;;  %v58_v25 = vld [vmem:[%s3379_s0 + $0x5] sm:$0x1]  ;;  %vm2784_vm2 = vmmov 0  }
  0x18   :  { %v2895_v23 = vsub.s32 %v113_v6, %v115_v7  ;;  %v59_v26 = vld [vmem:[%s3379_s0 + $0x6] sm:$0x1]  ;;  %2572 = vmatprep.subr.bf16.mxu0 %v2571_v10  ;;  %v60_v28 = vld [vmem:[%s3379_s0 + $0x7] sm:$0x1]  ;;  %v73_v29 = vunpack.c.l.bf16 %v57_v24  ;;  %v74_v30 = vunpack.c.l.bf16 %v58_v25  ;;  %v61_v32 = vld [vmem:[%s3379_s0 + $0x8] sm:$0x1]  ;;  %v109_v34 = vcombine.low %v69_v17, %v70_v20 }
  0x19   :  { %v75_v31 = vunpack.c.l.bf16 %v59_v26  ;;  %v62_v33 = vld [vmem:[%s3379_s0 + $0x9] sm:$0x1]  ;;  %v110_v35 = vcombine.low %v71_v21, %v72_v22  ;;  %v76_v36 = vunpack.c.l.bf16 %v60_v28  ;;  %v63_v37 = vld [vmem:[%s3379_s0 + $0xa] sm:$0x1]  ;;  %v64_v38 = vld [vmem:[%s3379_s0 + $0xb] sm:$0x1]  ;;  %v77_v39 = vunpack.c.l.bf16 %v61_v32 }
  0x1a   :  { %v65_v40 = vld [vmem:[%s3379_s0 + $0xc] sm:$0x1]  ;;  %v126_v41 = vcombine.low %v73_v29, %v74_v30  ;;  %v78_v42 = vunpack.c.l.bf16 %v62_v33  ;;  %v79_v43 = vunpack.c.l.bf16 %v63_v37  ;;  %v80_v44 = vunpack.c.l.bf16 %v64_v38  ;;  %v66_v45 = vld [vmem:[%s3379_s0 + $0xd] sm:$0x1]  ;;  %v67_v46 = vld [vmem:[%s3379_s0 + $0xe] sm:$0x1] }
  0x1b   :  { %v68_v47 = vld [vmem:[%s3379_s0 + $0xf] sm:$0x1]  ;;  %2574 = vmatpush3.bf16.msra.mxu0 %v2571_v10  ;;  %v117_v48 = vrot.slane %v109_v34, %v2895_v23  ;;  %v124_v49 = vrot.slane %v110_v35, %v2895_v23  ;;  %v127_v50 = vcombine.low %v75_v31, %v76_v36  ;;  %v81_v51 = vunpack.c.l.bf16 %v65_v40  ;;  %v2206_v8 = vld [vmem:[%s3381_s2] ss:$0 sm:$0xff]  ;;  %v2208_v12 = vld [vmem:[%s3381_s2 + $0x2] ss:$0 sm:$0xff] }
  0x1c   :  { %2576 = vmatprep.subr.bf16.mxu0 %v2575_v27  ;;  %v2579_v52 = vpack.c.bf16 %v92_v19, %v91_v18  ;;  %v143_v53 = vcombine.low %v77_v39, %v78_v42  ;;  %v144_v54 = vcombine.low %v79_v43, %v80_v44  ;;  %v82_v55 = vunpack.c.l.bf16 %v66_v45  ;;  %v2207_v13 = vld [vmem:[%s3381_s2 + $0x1] ss:$0 sm:$0xff]  ;;  %v2209_v19 = vld [vmem:[%s3381_s2 + $0x3] ss:$0 sm:$0xff]  ;;  %v2210_v26 = vld [vmem:[%s3381_s2 + $0x4] ss:$0 sm:$0xff] }
  0x1d   :  { %v125_v56 = vcombine.low %v117_v48, %v124_v49  ;;  %v83_v57 = vunpack.c.l.bf16 %v67_v46  ;;  %v84_v58 = vunpack.c.l.bf16 %v68_v47  ;;  %v134_v59 = vrot.slane %v126_v41, %v2895_v23  ;;  %v2211_v31 = vld [vmem:[%s3381_s2 + $0x5] ss:$0 sm:$0xff]  ;;  %v2212_v36 = vld [vmem:[%s3381_s2 + $0x6] ss:$0 sm:$0xff]  ;;  %v2213_v40 = vld [vmem:[%s3381_s2 + $0x7] ss:$0 sm:$0xff] }
  0x1e   :  { %v141_v60 = vrot.slane %v127_v50, %v2895_v23  ;;  %v160_v61 = vcombine.low %v81_v51, %v82_v55  ;;  %v151_v62 = vrot.slane %v143_v53, %v2895_v23  ;;  %v158_v63 = vrot.slane %v144_v54, %v2895_v23  ;;  %v2214_v41 = vld [vmem:[%s3381_s2 + $0x8] ss:$0 sm:$0xff]  ;;  %v2215_v46 = vld [vmem:[%s3381_s2 + $0x9] ss:$0 sm:$0xff]  ;;  %v2216_v51 = vld [vmem:[%s3381_s2 + $0xa] ss:$0 sm:$0xff] }
  0x1f   :  { %2578 = vmatpush3.bf16.msra.mxu0 %v2575_v27  ;;  %2363 = vmatprep.mubr.msk.f32.mxu0 %vm177_vm0, %v125_v56  ;;  %v161_v0 = vcombine.low %v83_v57, %v84_v58  ;;  %v2217_v56 = vld [vmem:[%s3381_s2 + $0xb] ss:$0 sm:$0xff]  ;;  %vm807_vm3 = vcmask 261120   ;;  %vm2185_vm4 = vcmask 9216  }
  0x20   :  { %2580 = vmatprep.subr.bf16.mxu0 %v2579_v52  ;;  %v142_v1 = vcombine.low %v134_v59, %v141_v60  ;;  %v168_v2 = vrot.slane %v160_v61, %v2895_v23  ;;  %v159_v4 = vcombine.low %v151_v62, %v158_v63  ;;  %v2218_v60 = vld [vmem:[%s3381_s2 + $0xc] ss:$0 sm:$0xff] }
  0x21   :  { %v175_v3 = vrot.slane %v161_v0, %v2895_v23 }
  0x23   :  { %2582 = vmatpush3.bf16.msra.mxu0 %v2579_v52  ;;  %v176_v5 = vcombine.low %v168_v2, %v175_v3 }
  0x26   :  { %2364 = vmatmul.mubr.msk.f32.vlgmr.msra.gmra.mrb[0].mxu0 %vm177_vm0, %v142_v1  ;;  %v2219_v1 = vld [vmem:[%s3381_s2 + $0xd] ss:$0 sm:$0xff] }
  0x27   :  { %2366 = vmatprep.mubr.msk.f32.mxu0 %vm177_vm0, %v159_v4 }
  0x2a   :  { %2367 = vmatmul.mubr.msk.f32.gmra.mrb[2].mxu0 %vm177_vm0, %v176_v5 }
  0xf9   :  { %v2365_v6 = vpop.f32.mrb[0].mxu0 }
  0xfa   :  { %v252_v7 = vpop.f32.mrb[1].mxu0  ;;  %v292_v11 = vcombine.high %v2365_v6, %v2365_v6  ;;  %v299_v14 = vrot.slane %v2365_v6, %v2895_v23 }
  0xfb   :  { %v275_v9 = vcombine.high %v252_v7, %v252_v7  ;;  %v282_v10 = vrot.slane %v252_v7, %v2895_v23  ;;  %v2221_v7 = vld [vmem:[%s3381_s2 + $0xf] ss:$0 sm:$0xff] }
  0xfc   :  { %v306_v27 = vrot.slane %v292_v11, %v2895_v23  ;;  %v307_v28 = vcombine.high %v299_v14, %v299_v14  ;;  %v2981_v33 = vadd.f32 %v2210_v26, %v299_v14 }
  0xfd   :  { %v290_v15 = vcombine.high %v282_v10, %v282_v10  ;;  %v2956_v16 = vadd.f32 %v2206_v8, %v282_v10  ;;  %v289_v17 = vrot.slane %v275_v9, %v2895_v23  ;;  %v2368_v18 = vpop.f32.mrb[2].mxu0 }
  0xfe   :  { %v262_v20 = vpop.f32.mrb[3].mxu0  ;;  %v2989_v38 = vadd.f32 %v2211_v31, %v307_v28  ;;  %v308_v39 = vcombine.high %v306_v27, %v306_v27  ;;  %v500_v42 = vsel %vm487_vm1, %v2981_v33, 0.0  ;;  %v3000_v45 = vadd.f32 %v2212_v36, %v306_v27 }
  0xff   :  { %v488_v21 = vsel %vm487_vm1, %v2956_v16, 0.0  ;;  %v2964_v22 = vadd.f32 %v2208_v12, %v289_v17  ;;  %v2966_v24 = vadd.f32 %v2207_v13, %v290_v15  ;;  %v291_v25 = vcombine.high %v289_v17, %v289_v17 }
 0x100   :  { %489 = vadd.xlane.f32.xlu0 %v488_v21  ;;  %v309_v34 = vcombine.high %v262_v20, %v262_v20  ;;  %v316_v35 = vrot.slane %v262_v20, %v2895_v23  ;;  %v503_v47 = vsel %vm487_vm1, %v2989_v38, 0.0  ;;  %v3007_v48 = vadd.f32 %v2213_v40, %v308_v39 }
 0x101   :  { %v494_v29 = vsel %vm487_vm1, %v2964_v22, 0.0  ;;  %v2974_v30 = vadd.f32 %v2209_v19, %v291_v25  ;;  %v491_v32 = vsel %vm487_vm1, %v2966_v24, 0.0  ;;  %v326_v50 = vcombine.high %v2368_v18, %v2368_v18 }
 0x102   :  { %495 = vadd.xlane.f32.xlu1 %v494_v29  ;;  %v323_v43 = vrot.slane %v309_v34, %v2895_v23  ;;  %v324_v44 = vcombine.high %v316_v35, %v316_v35  ;;  %v3009_v49 = vadd.f32 %v2214_v41, %v316_v35  ;;  %v333_v52 = vrot.slane %v2368_v18, %v2895_v23 }
 0x103   :  { %v497_v37 = vsel %vm487_vm1, %v2974_v30, 0.0  ;;  %v506_v53 = vsel %vm487_vm1, %v3000_v45, 0.0  ;;  %v509_v57 = vsel %vm487_vm1, %v3007_v48, 0.0  ;;  %v340_v61 = vrot.slane %v326_v50, %v2895_v23  ;;  %v2220_v23 = vld [vmem:[%s3381_s2 + $0xe] ss:$0 sm:$0xff]  ;;  %s2193_s2 = sshll.u32 %s2786_s25, 4  ;;  %s2194_s2 = int_to_ptr.vmem [resolvable:$true] %s2193_s2 }
 0x104   :  { %492 = vadd.xlane.f32.xlu0 %v491_v32  ;;  %v3017_v54 = vadd.f32 %v2215_v46, %v324_v44  ;;  %v325_v55 = vcombine.high %v323_v43, %v323_v43  ;;  %v512_v58 = vsel %vm487_vm1, %v3009_v49, 0.0  ;;  %v3026_v59 = vadd.f32 %v2216_v51, %v323_v43  ;;  %p2758_p9 = scmp.lt.s32.totalorder %s2194_s2, %s2194_s2 }
 0x105   :  { %v341_v62 = vcombine.high %v333_v52, %v333_v52  ;;  %v3041_v3 = vadd.f32 %v2218_v60, %v333_v52  ;;  %v342_v6 = vcombine.high %v340_v61, %v340_v61  ;;  %v3055_v9 = vadd.f32 %v2220_v23, %v340_v61 }
 0x106   :  { %498 = vadd.xlane.f32.xlu1 %v497_v37  ;;  %v515_v63 = vsel %vm487_vm1, %v3017_v54, 0.0  ;;  %v3034_v0 = vadd.f32 %v2217_v56, %v325_v55  ;;  %v518_v2 = vsel %vm487_vm1, %v3026_v59, 0.0 }
 0x107   :  { %v3048_v5 = vadd.f32 %v2219_v1, %v341_v62  ;;  %v524_v8 = vsel %vm487_vm1, %v3041_v3, 0.0  ;;  %v3059_v11 = vadd.f32 %v2221_v7, %v342_v6  ;;  %v530_v12 = vsel %vm487_vm1, %v3055_v9, 0.0 }
 0x108   :  { %501 = vadd.xlane.f32.xlu0 %v500_v42  ;;  %v521_v4 = vsel %vm487_vm1, %v3034_v0, 0.0 }
 0x109   :  { %v527_v10 = vsel %vm487_vm1, %v3048_v5, 0.0  ;;  %v533_v13 = vsel %vm487_vm1, %v3059_v11, 0.0 }
 0x10a   :  { %504 = vadd.xlane.f32.xlu1 %v503_v47 }
 0x10c   :  { %507 = vadd.xlane.f32.xlu0 %v506_v53 }
 0x10e   :  { %510 = vadd.xlane.f32.xlu1 %v509_v57 }
 0x110   :  { %513 = vadd.xlane.f32.xlu0 %v512_v58 }
 0x112   :  { %516 = vadd.xlane.f32.xlu1 %v515_v63 }
 0x114   :  { %519 = vadd.xlane.f32.xlu0 %v518_v2 }
 0x116   :  { %522 = vadd.xlane.f32.xlu1 %v521_v4 }
 0x118   :  { %525 = vadd.xlane.f32.xlu0 %v524_v8 }
 0x11a   :  { %528 = vadd.xlane.f32.xlu1 %v527_v10 }
 0x11c   :  { %531 = vadd.xlane.f32.xlu0 %v530_v12 }
 0x11e   :  { %534 = vadd.xlane.f32.xlu1 %v533_v13 }
 0x18d   :  { %v490_v14 = vpop.xlane.xlu0 %489 }
 0x18e   :  { %v537_v15 = vmul.f32 0.03125, %v490_v14 }
 0x18f   :  { %v496_v17 = vpop.xlane.xlu1 %495 }
 0x190   :  { %v3066_v18 = vsub.f32 %v2956_v16, %v537_v15  ;;  %v539_v19 = vmul.f32 0.03125, %v496_v17 }
 0x191   :  { %v493_v20 = vpop.xlane.xlu0 %492 }
 0x192   :  { %v3069_v21 = vsub.f32 %v2964_v22, %v539_v19  ;;  %v538_v25 = vmul.f32 0.03125, %v493_v20  ;;  %v569_v26 = vmul.f32 %v3066_v18, %v3066_v18 }
 0x193   :  { %v499_v27 = vpop.xlane.xlu1 %498 }
 0x194   :  { %v3074_v28 = vsub.f32 %v2966_v24, %v538_v25  ;;  %v540_v29 = vmul.f32 0.03125, %v499_v27  ;;  %v585_v31 = vsel %vm487_vm1, %v569_v26, 0.0  ;;  %v571_v16 = vmul.f32 %v3069_v21, %v3069_v21 }
 0x195   :  { %v502_v32 = vpop.xlane.xlu0 %501  ;;  %586 = vadd.xlane.f32.xlu0 %v585_v31 }
 0x196   :  { %v3080_v34 = vsub.f32 %v2974_v30, %v540_v29  ;;  %v541_v22 = vmul.f32 0.03125, %v502_v32  ;;  %v570_v35 = vmul.f32 %v3074_v28, %v3074_v28  ;;  %v591_v37 = vsel %vm487_vm1, %v571_v16, 0.0 }
 0x197   :  { %v505_v36 = vpop.xlane.xlu1 %504 }
 0x198   :  { %v3086_v24 = vsub.f32 %v2981_v33, %v541_v22  ;;  %v542_v39 = vmul.f32 0.03125, %v505_v36  ;;  %v588_v40 = vsel %vm487_vm1, %v570_v35, 0.0  ;;  %v572_v41 = vmul.f32 %v3080_v34, %v3080_v34 }
 0x199   :  { %v508_v42 = vpop.xlane.xlu0 %507  ;;  %592 = vadd.xlane.f32.xlu0 %v591_v37  ;;  %589 = vadd.xlane.f32.xlu1 %v588_v40  ;;  %v744_v40 = vld [vmem:[#allocation2 + $0x8] sm:$0xff] }
 0x19a   :  { %v3092_v30 = vsub.f32 %v2989_v38, %v542_v39  ;;  %v543_v43 = vmul.f32 0.03125, %v508_v42  ;;  %v573_v44 = vmul.f32 %v3086_v24, %v3086_v24  ;;  %v594_v33 = vsel %vm487_vm1, %v572_v41, 0.0  ;;  %v743_v39 = vld [vmem:[#allocation2] sm:$0xff] }
 0x19b   :  { %v511_v46 = vpop.xlane.xlu1 %510  ;;  %v2584_v41 = vpack.c.bf16 %v744_v40, %v743_v39  ;;  %v2783_v42 = vmov 0.0|0.0   ;;  %v749_v39 = vld [vmem:[#allocation2 + $0x30] sm:$0xff] }
 0x19c   :  { %v3098_v47 = vsub.f32 %v3000_v45, %v543_v43  ;;  %v544_v50 = vmul.f32 0.03125, %v511_v46  ;;  %v597_v51 = vsel %vm487_vm1, %v573_v44, 0.0  ;;  %v574_v52 = vmul.f32 %v3092_v30, %v3092_v30  ;;  %2583 = vmatprep.subr.bf16.mxu1 %v2783_v42  ;;  %2595 = vmatprep.subr.bf16.mxu0 %v2783_v42  ;;  %v745_v43 = vld [vmem:[#allocation2 + $0x10] sm:$0xff]  ;;  %v746_v44 = vld [vmem:[#allocation2 + $0x18] sm:$0xff]  ;;  %v751_v46 = vld [vmem:[#allocation2 + $0x40] sm:$0xff] }
 0x19d   :  { %v514_v53 = vpop.xlane.xlu0 %513  ;;  %598 = vadd.xlane.f32.xlu0 %v597_v51  ;;  %595 = vadd.xlane.f32.xlu1 %v594_v33  ;;  %v2587_v33 = vpack.c.bf16 %v746_v44, %v745_v43  ;;  %v750_v43 = vld [vmem:[#allocation2 + $0x38] sm:$0xff]  ;;  %v759_v44 = vld [vmem:[#allocation2 + $0x80] sm:$0xff] }
 0x19e   :  { %v3104_v38 = vsub.f32 %v3007_v48, %v544_v50  ;;  %v545_v55 = vmul.f32 0.03125, %v514_v53  ;;  %v575_v56 = vmul.f32 %v3098_v47, %v3098_v47  ;;  %v600_v45 = vsel %vm487_vm1, %v574_v52, 0.0  ;;  %2585 = vmatpush3.bf16.msra.mxu1 %v2584_v41  ;;  %v752_v50 = vld [vmem:[#allocation2 + $0x48] sm:$0xff]  ;;  %v753_v52 = vld [vmem:[#allocation2 + $0x50] sm:$0xff]  ;;  %v754_v53 = vld [vmem:[#allocation2 + $0x58] sm:$0xff] }
 0x19f   :  { %v517_v57 = vpop.xlane.xlu1 %516  ;;  %2586 = vmatprep.subr.bf16.mxu1 %v2783_v42  ;;  %v2596_v51 = vpack.c.bf16 %v752_v50, %v751_v46  ;;  %v760_v46 = vld [vmem:[#allocation2 + $0x88] sm:$0xff] }
 0x1a0   :  { %v3110_v58 = vsub.f32 %v3009_v49, %v545_v55  ;;  %v546_v60 = vmul.f32 0.03125, %v517_v57  ;;  %v603_v61 = vsel %vm487_vm1, %v575_v56, 0.0  ;;  %v576_v62 = vmul.f32 %v3104_v38, %v3104_v38 }
 0x1a1   :  { %604 = vadd.xlane.f32.xlu0 %v603_v61  ;;  %v520_v63 = vpop.xlane.xlu0 %519  ;;  %601 = vadd.xlane.f32.xlu1 %v600_v45  ;;  %v2785_v55 = vmov 0.0   ;;  %v2599_v56 = vpack.c.bf16 %v754_v53, %v753_v52 }
 0x1a2   :  { %v3116_v48 = vsub.f32 %v3017_v54, %v546_v60  ;;  %v547_v1 = vmul.f32 0.03125, %v520_v63  ;;  %v577_v2 = vmul.f32 %v3110_v58, %v3110_v58  ;;  %v606_v49 = vsel %vm487_vm1, %v576_v62, 0.0  ;;  %2588 = vmatpush3.bf16.msra.mxu1 %v2587_v33  ;;  %2597 = vmatpush3.bf16.msra.mxu0 %v2596_v51 }
 0x1a3   :  { %v523_v23 = vpop.xlane.xlu1 %522  ;;  %2589 = vmatprep.subr.bf16.mxu1 %v2783_v42  ;;  %2598 = vmatprep.subr.bf16.mxu0 %v2783_v42 }
 0x1a4   :  { %v3122_v4 = vsub.f32 %v3026_v59, %v547_v1  ;;  %v548_v6 = vmul.f32 0.03125, %v523_v23  ;;  %v609_v7 = vsel %vm487_vm1, %v577_v2, 0.0  ;;  %v578_v8 = vmul.f32 %v3116_v48, %v3116_v48  ;;  %2377 = vmatprep.mubr.msk.f32.mxu1 %vm2784_vm2, %v2785_v55  ;;  %2399 = vmatprep.mubr.msk.f32.mxu0 %vm2784_vm2, %v2785_v55 }
 0x1a5   :  { %610 = vadd.xlane.f32.xlu0 %v609_v7  ;;  %v526_v10 = vpop.xlane.xlu0 %525  ;;  %607 = vadd.xlane.f32.xlu1 %v606_v49 }
 0x1a6   :  { %v3128_v54 = vsub.f32 %v3034_v0, %v548_v6  ;;  %v549_v12 = vmul.f32 0.03125, %v526_v10  ;;  %v579_v13 = vmul.f32 %v3122_v4, %v3122_v4  ;;  %v612_v59 = vsel %vm487_vm1, %v578_v8, 0.0  ;;  %2600 = vmatpush3.bf16.msra.mxu0 %v2599_v56 }
 0x1a7   :  { %v529_v14 = vpop.xlane.xlu1 %528  ;;  %2607 = vmatprep.subr.bf16.mxu0 %v2783_v42  ;;  %v2593_v56 = vpack.c.bf16 %v750_v43, %v749_v39  ;;  %v769_v39 = vld [vmem:[#allocation2 + $0xd0] sm:$0xff] }
 0x1a8   :  { %v3134_v15 = vsub.f32 %v3041_v3, %v549_v12  ;;  %v550_v17 = vmul.f32 0.03125, %v529_v14  ;;  %v615_v19 = vsel %vm487_vm1, %v579_v13, 0.0  ;;  %v580_v20 = vmul.f32 %v3128_v54, %v3128_v54 }
 0x1a9   :  { %616 = vadd.xlane.f32.xlu0 %v615_v19  ;;  %v532_v25 = vpop.xlane.xlu0 %531  ;;  %613 = vadd.xlane.f32.xlu1 %v612_v59 }
 0x1aa   :  { %v3140_v0 = vsub.f32 %v3048_v5, %v550_v17  ;;  %v551_v26 = vmul.f32 0.03125, %v532_v25  ;;  %v581_v27 = vmul.f32 %v3134_v15, %v3134_v15  ;;  %v618_v3 = vsel %vm487_vm1, %v580_v20, 0.0  ;;  %v3174_v17 = vld [vmem:[%s3382_s3] ss:$0 sm:$0xff] }
 0x1ab   :  { %v535_v29 = vpop.xlane.xlu1 %534 }
 0x1ac   :  { %v3146_v31 = vsub.f32 %v3055_v9, %v551_v26  ;;  %v552_v16 = vmul.f32 0.03125, %v535_v29  ;;  %v621_v32 = vsel %vm487_vm1, %v581_v27, 0.0  ;;  %v582_v22 = vmul.f32 %v3140_v0, %v3140_v0  ;;  %v747_v26 = vld [vmem:[#allocation2 + $0x20] sm:$0xff]  ;;  %v748_v27 = vld [vmem:[#allocation2 + $0x28] sm:$0xff] }
 0x1ad   :  { %622 = vadd.xlane.f32.xlu0 %v621_v32  ;;  %619 = vadd.xlane.f32.xlu1 %v618_v3  ;;  %v3180_v32 = vld [vmem:[%s3383_s4] ss:$0 sm:$0xff] }
 0x1ae   :  { %v3152_v5 = vsub.f32 %v3059_v11, %v552_v16  ;;  %v583_v35 = vmul.f32 %v3146_v31, %v3146_v31  ;;  %v624_v37 = vsel %vm487_vm1, %v582_v22, 0.0 }
 0x1b0   :  { %v627_v36 = vsel %vm487_vm1, %v583_v35, 0.0  ;;  %v584_v9 = vmul.f32 %v3152_v5, %v3152_v5  ;;  %v2590_v35 = vpack.c.bf16 %v748_v27, %v747_v26 }
 0x1b1   :  { %628 = vadd.xlane.f32.xlu0 %v627_v36  ;;  %625 = vadd.xlane.f32.xlu1 %v624_v37 }
 0x1b2   :  { %v630_v11 = vsel %vm487_vm1, %v584_v9, 0.0 }
 0x1b5   :  { %631 = vadd.xlane.f32.xlu1 %v630_v11 }
 0x222   :  { %v587_v57 = vpop.xlane.xlu0 %586 }
 0x223   :  { %v633_v45 = vmul.f32 0.03125, %v587_v57  ;;  %v2608_v57 = vpack.c.bf16 %v760_v46, %v759_v44 }
 0x225   :  { %v649_v60 = vadd.f32 1e-05, %v633_v45 }
 0x226   :  { %v593_v61 = vpop.xlane.xlu0 %592  ;;  %v590_v62 = vpop.xlane.xlu1 %589 }
 0x227   :  { %2699 = vrsqrt.f32 %v649_v60  ;;  %v635_v63 = vmul.f32 0.03125, %v593_v61  ;;  %v634_v1 = vmul.f32 0.03125, %v590_v62 }
 0x229   :  { %v651_v2 = vadd.f32 1e-05, %v635_v63  ;;  %v650_v23 = vadd.f32 1e-05, %v634_v1  ;;  %v756_v63 = vld [vmem:[#allocation2 + $0x68] sm:$0xff]  ;;  %v761_v1 = vld [vmem:[#allocation2 + $0x90] sm:$0xff] }
 0x22a   :  { %v599_v49 = vpop.xlane.xlu0 %598  ;;  %v596_v6 = vpop.xlane.xlu1 %595 }
 0x22b   :  { %2701 = vrsqrt.f32 %v651_v2  ;;  %v637_v7 = vmul.f32 0.03125, %v599_v49  ;;  %v636_v8 = vmul.f32 0.03125, %v596_v6  ;;  %v762_v2 = vld [vmem:[#allocation2 + $0x98] sm:$0xff] }
 0x22c   :  { %2703 = vrsqrt.f32 %v650_v23 }
 0x22d   :  { %v653_v10 = vadd.f32 1e-05, %v637_v7  ;;  %v652_v12 = vadd.f32 1e-05, %v636_v8  ;;  %v757_v8 = vld [vmem:[#allocation2 + $0x70] sm:$0xff] }
 0x22e   :  { %v605_v13 = vpop.xlane.xlu0 %604  ;;  %v602_v14 = vpop.xlane.xlu1 %601 }
 0x22f   :  { %2705 = vrsqrt.f32 %v653_v10  ;;  %v639_v59 = vmul.f32 0.03125, %v605_v13  ;;  %v638_v25 = vmul.f32 0.03125, %v602_v14 }
 0x230   :  { %2707 = vrsqrt.f32 %v652_v12 }
 0x231   :  { %v2700_v19 = vpop.eup %2699  ;;  %v655_v20 = vadd.f32 1e-05, %v639_v59  ;;  %v654_v37 = vadd.f32 1e-05, %v638_v25  ;;  %v758_v59 = vld [vmem:[#allocation2 + $0x78] sm:$0xff] }
 0x232   :  { %v611_v29 = vpop.xlane.xlu0 %610  ;;  %v608_v3 = vpop.xlane.xlu1 %607  ;;  %v681_v16 = vmul.f32 %v2700_v19, %v3066_v18  ;;  %v767_v19 = vld [vmem:[#allocation2 + $0xc0] sm:$0xff]  ;;  %v2605_v27 = vpack.c.bf16 %v758_v59, %v757_v8  ;;  %v774_v59 = vld [vmem:[#allocation2 + $0xf8] sm:$0xff] }
 0x233   :  { %2709 = vrsqrt.f32 %v655_v20  ;;  %v641_v9 = vmul.f32 0.03125, %v611_v29  ;;  %v640_v51 = vmul.f32 0.03125, %v608_v3  ;;  %v768_v20 = vld [vmem:[#allocation2 + $0xc8] sm:$0xff]  ;;  %v763_v3 = vld [vmem:[#allocation2 + $0xa0] sm:$0xff] }
 0x234   :  { %v704_v22 = vmul.f32 %v3174_v17, %v681_v16  ;;  %2711 = vrsqrt.f32 %v654_v37  ;;  %v2620_v29 = vpack.c.bf16 %v768_v20, %v767_v19  ;;  %v764_v16 = vld [vmem:[#allocation2 + $0xa8] sm:$0xff]  ;;  %v783_v19 = vld [vmem:[#allocation2 + $0x140] sm:$0xff] }
 0x235   :  { %v2702_v36 = vpop.eup %2701  ;;  %v657_v53 = vadd.f32 1e-05, %v641_v9  ;;  %v656_v49 = vadd.f32 1e-05, %v640_v51  ;;  %v784_v20 = vld [vmem:[#allocation2 + $0x148] sm:$0xff] }
 0x236   :  { %v2704_v40 = vpop.eup %2703  ;;  %v683_v41 = vmul.f32 %v2702_v36, %v3069_v21  ;;  %v614_v11 = vpop.xlane.xlu1 %613  ;;  %v727_v18 = vadd.f32 %v3180_v32, %v704_v22  ;;  %v755_v21 = vld [vmem:[#allocation2 + $0x60] sm:$0xff] }
 0x237   :  { %v682_v33 = vmul.f32 %v2704_v40, %v3074_v28  ;;  %v617_v28 = vpop.xlane.xlu0 %616  ;;  %2713 = vrsqrt.f32 %v657_v53  ;;  %v2602_v7 = vpack.c.bf16 %v756_v63, %v755_v21  ;;  %v642_v26 = vmul.f32 0.03125, %v614_v11  ;;  %v770_v40 = vld [vmem:[#allocation2 + $0xd8] sm:$0xff]  ;;  %v772_v63 = vld [vmem:[#allocation2 + $0xe8] sm:$0xff] }
 0x238   :  { %v706_v50 = vmul.f32 %v3174_v17, %v683_v41  ;;  %2378 = vmatmul.mubr.msk.f32.vlgmr.msra.gmra.mrb[0].mxu1 %vm807_vm3, %v727_v18  ;;  %v643_v6 = vmul.f32 0.03125, %v617_v28  ;;  %2715 = vrsqrt.f32 %v656_v49  ;;  %v2623_v46 = vpack.c.bf16 %v770_v40, %v769_v39  ;;  %v766_v53 = vld [vmem:[#allocation2 + $0xb8] sm:$0xff] }
 0x239   :  { %v2706_v52 = vpop.eup %2705  ;;  %2591 = vmatpush3.bf16.msra.mxu1 %v2590_v35  ;;  %2388 = vmatprep.mubr.msk.f32.mxu1 %vm2784_vm2, %v2785_v55  ;;  %v705_v62 = vmul.f32 %v3174_v17, %v682_v33  ;;  %v658_v18 = vadd.f32 1e-05, %v642_v26  ;;  %v765_v33 = vld [vmem:[#allocation2 + $0xb0] sm:$0xff] }
 0x23a   :  { %v729_v45 = vadd.f32 %v3180_v32, %v706_v50  ;;  %v685_v60 = vmul.f32 %v2706_v52, %v3086_v24  ;;  %v3192_v61 = vpop.xlane.xlu1 %619  ;;  %2592 = vmatprep.subr.bf16.mxu1 %v2783_v42  ;;  %v2708_v23 = vpop.eup %2707  ;;  %v2611_v24 = vpack.c.bf16 %v762_v2, %v761_v1  ;;  %v2617_v28 = vpack.c.bf16 %v766_v53, %v765_v33  ;;  %v777_v1 = vld [vmem:[#allocation2 + $0x110] sm:$0xff]  ;;  %v778_v2 = vld [vmem:[#allocation2 + $0x118] sm:$0xff] }
 0x23b   :  { %v684_v10 = vmul.f32 %v2708_v23, %v3080_v34  ;;  %v728_v13 = vadd.f32 %v3180_v32, %v705_v62  ;;  %v659_v34 = vadd.f32 1e-05, %v643_v6  ;;  %v623_v35 = vpop.xlane.xlu0 %622  ;;  %v2635_v8 = vpack.c.bf16 %v778_v2, %v777_v1  ;;  %v782_v33 = vld [vmem:[#allocation2 + $0x138] sm:$0xff]  ;;  %v789_v2 = vld [vmem:[#allocation2 + $0x170] sm:$0xff] }
 0x23c   :  { %2400 = vmatmul.mubr.msk.f32.vlgmr.msra.gmra.mrb[4].mxu0 %vm807_vm3, %v729_v45  ;;  %v708_v14 = vmul.f32 %v3174_v17, %v685_v60  ;;  %v645_v43 = vmul.f32 0.03125, %v623_v35  ;;  %v644_v60 = vmul.f32 0.03125, %v3192_v61  ;;  %v779_v35 = vld [vmem:[#allocation2 + $0x120] sm:$0xff] }
 0x23d   :  { %2594 = vmatpush3.bf16.msra.mxu1 %v2593_v56  ;;  %2609 = vmatpush3.bf16.msra.mxu0 %v2608_v57  ;;  %v2710_v25 = vpop.eup %2709  ;;  %v707_v9 = vmul.f32 %v3174_v17, %v684_v10  ;;  %2717 = vrsqrt.f32 %v659_v34  ;;  %v775_v56 = vld [vmem:[#allocation2 + $0x100] sm:$0xff]  ;;  %v776_v57 = vld [vmem:[#allocation2 + $0x108] sm:$0xff]  ;;  %v773_v10 = vld [vmem:[#allocation2 + $0xf0] sm:$0xff] }
 0x23e   :  { %v3198_v12 = vpop.xlane.xlu1 %625  ;;  %2601 = vmatprep.subr.bf16.mxu1 %v2783_v42  ;;  %2610 = vmatprep.subr.bf16.mxu0 %v2783_v42  ;;  %v687_v22 = vmul.f32 %v2710_v25, %v3098_v47  ;;  %v731_v37 = vadd.f32 %v3180_v32, %v708_v14  ;;  %v2712_v41 = vpop.eup %2711  ;;  %v2614_v47 = vpack.c.bf16 %v764_v16, %v763_v3  ;;  %v661_v45 = vadd.f32 1e-05, %v645_v43  ;;  %v781_v43 = vld [vmem:[#allocation2 + $0x130] sm:$0xff] }
 0x23f   :  { %2421 = vmatprep.mubr.msk.f32.mxu0 %vm2784_vm2, %v2785_v55  ;;  %v686_v50 = vmul.f32 %v2712_v41, %v3092_v30  ;;  %v730_v51 = vadd.f32 %v3180_v32, %v707_v9  ;;  %v771_v30 = vld [vmem:[#allocation2 + $0xe0] sm:$0xff]  ;;  %v2632_v62 = vpack.c.bf16 %v776_v57, %v775_v56  ;;  %v629_v6 = vpop.xlane.xlu0 %628  ;;  %v646_v16 = vmul.f32 0.03125, %v3198_v12  ;;  %v785_v41 = vld [vmem:[#allocation2 + $0x150] sm:$0xff] }
 0x240   :  { %2389 = vmatmul.mubr.msk.f32.vlgmr.msra.gmra.mrb[2].mxu1 %vm807_vm3, %v728_v13  ;;  %v710_v52 = vmul.f32 %v3174_v17, %v687_v22  ;;  %v2626_v61 = vpack.c.bf16 %v772_v63, %v771_v30  ;;  %v647_v14 = vmul.f32 0.03125, %v629_v6  ;;  %v2641_v53 = vpack.c.bf16 %v782_v33, %v781_v43  ;;  %v787_v57 = vld [vmem:[#allocation2 + $0x160] sm:$0xff] }
 0x241   :  { %2603 = vmatpush3.bf16.msra.mxu1 %v2602_v7  ;;  %2612 = vmatpush3.bf16.msra.mxu0 %v2611_v24  ;;  %v2714_v21 = vpop.eup %2713  ;;  %v709_v24 = vmul.f32 %v3174_v17, %v686_v50  ;;  %v791_v50 = vld [vmem:[#allocation2 + $0x180] sm:$0xff] }
 0x242   :  { %v632_v36 = vpop.xlane.xlu1 %631  ;;  %2604 = vmatprep.subr.bf16.mxu1 %v2783_v42  ;;  %2619 = vmatprep.subr.bf16.mxu0 %v2783_v42  ;;  %v2716_v23 = vpop.eup %2715  ;;  %v689_v49 = vmul.f32 %v2714_v21, %v3110_v58  ;;  %v733_v7 = vadd.f32 %v3180_v32, %v710_v52  ;;  %v660_v58 = vadd.f32 1e-05, %v644_v60  ;;  %v663_v3 = vadd.f32 1e-05, %v647_v14  ;;  %v788_v60 = vld [vmem:[#allocation2 + $0x168] sm:$0xff] }
 0x243   :  { %v648_v11 = vmul.f32 0.03125, %v632_v36  ;;  %2410 = vmatprep.mubr.msk.f32.mxu1 %vm2784_vm2, %v2785_v55  ;;  %v688_v13 = vmul.f32 %v2716_v23, %v3104_v38  ;;  %v732_v25 = vadd.f32 %v3180_v32, %v709_v24  ;;  %v2629_v38 = vpack.c.bf16 %v774_v59, %v773_v10  ;;  %v780_v36 = vld [vmem:[#allocation2 + $0x128] sm:$0xff]  ;;  %v799_v24 = vld [vmem:[#allocation2 + $0x1c0] sm:$0xff] }
 0x244   :  { %2422 = vmatmul.mubr.msk.f32.vlgmr.msra.gmra.mrb[6].mxu0 %vm807_vm3, %v731_v37  ;;  %v712_v26 = vmul.f32 %v3174_v17, %v689_v49 }
 0x245   :  { %v664_v44 = vadd.f32 1e-05, %v648_v11  ;;  %2606 = vmatpush3.bf16.msra.mxu1 %v2605_v27  ;;  %2621 = vmatpush3.bf16.msra.mxu0 %v2620_v29  ;;  %v2644_v27 = vpack.c.bf16 %v784_v20, %v783_v19  ;;  %v711_v22 = vmul.f32 %v3174_v17, %v688_v13  ;;  %v786_v11 = vld [vmem:[#allocation2 + $0x158] sm:$0xff]  ;;  %v795_v13 = vld [vmem:[#allocation2 + $0x1a0] sm:$0xff]  ;;  %v796_v19 = vld [vmem:[#allocation2 + $0x1a8] sm:$0xff] }
 0x246   :  { %2613 = vmatprep.subr.bf16.mxu1 %v2783_v42  ;;  %2622 = vmatprep.subr.bf16.mxu0 %v2783_v42  ;;  %v735_v40 = vadd.f32 %v3180_v32, %v712_v26  ;;  %v801_v20 = vld [vmem:[#allocation2 + $0x1d0] sm:$0xff] }
 0x247   :  { %2719 = vrsqrt.f32 %v664_v44  ;;  %2443 = vmatprep.mubr.msk.f32.mxu0 %vm2784_vm2, %v2785_v55  ;;  %v2718_v34 = vpop.eup %2717  ;;  %v734_v44 = vadd.f32 %v3180_v32, %v711_v22 }
 0x248   :  { %2721 = vrsqrt.f32 %v658_v18  ;;  %2411 = vmatmul.mubr.msk.f32.vlgmr.msra.gmra.mrb[4].mxu1 %vm807_vm3, %v730_v51  ;;  %v691_v9 = vmul.f32 %v2718_v34, %v3122_v4  ;;  %v2638_v18 = vpack.c.bf16 %v780_v36, %v779_v35  ;;  %v792_v51 = vld [vmem:[#allocation2 + $0x188] sm:$0xff]  ;;  %v803_v36 = vld [vmem:[#allocation2 + $0x1e0] sm:$0xff] }
 0x249   :  { %2615 = vmatpush3.bf16.msra.mxu1 %v2614_v47  ;;  %2624 = vmatpush3.bf16.msra.mxu0 %v2623_v46  ;;  %2723 = vrsqrt.f32 %v661_v45  ;;  %v2647_v47 = vpack.c.bf16 %v786_v11, %v785_v41  ;;  %v2656_v56 = vpack.c.bf16 %v792_v51, %v791_v50  ;;  %v806_v41 = vld [vmem:[#allocation2 + $0x1f8] sm:$0xff]  ;;  %v2017_v11 = vld [vmem:[%s3386_s7 + $0x8] sm:$0xff] }
 0x24a   :  { %2616 = vmatprep.subr.bf16.mxu1 %v2783_v42  ;;  %2631 = vmatprep.subr.bf16.mxu0 %v2783_v42  ;;  %2725 = vrsqrt.f32 %v660_v58  ;;  %v714_v46 = vmul.f32 %v3174_v17, %v691_v9 }
 0x24b   :  { %2432 = vmatprep.mubr.msk.f32.mxu1 %vm2784_vm2, %v2785_v55  ;;  %2727 = vrsqrt.f32 %v663_v3  ;;  %v797_v3 = vld [vmem:[#allocation2 + $0x1b0] sm:$0xff] }
 0x24c   :  { %2444 = vmatmul.mubr.msk.f32.vlgmr.msra.gmra.mrb[8].mxu0 %vm807_vm3, %v733_v7  ;;  %v737_v30 = vadd.f32 %v3180_v32, %v714_v46  ;;  %v790_v7 = vld [vmem:[#allocation2 + $0x178] sm:$0xff] }
 0x24d   :  { %2618 = vmatpush3.bf16.msra.mxu1 %v2617_v28  ;;  %2633 = vmatpush3.bf16.msra.mxu0 %v2632_v62  ;;  %v793_v28 = vld [vmem:[#allocation2 + $0x190] sm:$0xff]  ;;  %v794_v62 = vld [vmem:[#allocation2 + $0x198] sm:$0xff] }
 0x24e   :  { %2625 = vmatprep.subr.bf16.mxu1 %v2783_v42  ;;  %2634 = vmatprep.subr.bf16.mxu0 %v2783_v42  ;;  %v2659_v1 = vpack.c.bf16 %v794_v62, %v793_v28 }
 0x24f   :  { %2465 = vmatprep.mubr.msk.f32.mxu0 %vm2784_vm2, %v2785_v55 }
 0x250   :  { %2433 = vmatmul.mubr.msk.f32.vlgmr.msra.gmra.mrb[6].mxu1 %vm807_vm3, %v732_v25  ;;  %v802_v25 = vld [vmem:[#allocation2 + $0x1d8] sm:$0xff] }
 0x251   :  { %v2720_v29 = vpop.eup %2719  ;;  %2627 = vmatpush3.bf16.msra.mxu1 %v2626_v61  ;;  %2636 = vmatpush3.bf16.msra.mxu0 %v2635_v8  ;;  %v800_v61 = vld [vmem:[#allocation2 + $0x1c8] sm:$0xff]  ;;  %v2671_v34 = vpack.c.bf16 %v802_v25, %v801_v20 }
 0x252   :  { %v2722_v37 = vpop.eup %2721  ;;  %v696_v39 = vmul.f32 %v2720_v29, %v3152_v5  ;;  %2628 = vmatprep.subr.bf16.mxu1 %v2783_v42  ;;  %2643 = vmatprep.subr.bf16.mxu0 %v2783_v42  ;;  %v662_v5 = vadd.f32 1e-05, %v646_v16  ;;  %v2668_v10 = vpack.c.bf16 %v800_v61, %v799_v24  ;;  %v798_v16 = vld [vmem:[#allocation2 + $0x1b8] sm:$0xff] }
 0x253   :  { %2454 = vmatprep.mubr.msk.f32.mxu1 %vm2784_vm2, %v2785_v55  ;;  %v690_v4 = vmul.f32 %v2722_v37, %v3116_v48  ;;  %v2724_v48 = vpop.eup %2723  ;;  %v2665_v22 = vpack.c.bf16 %v798_v16, %v797_v3  ;;  %v804_v37 = vld [vmem:[#allocation2 + $0x1e8] sm:$0xff] }
 0x254   :  { %v719_v12 = vmul.f32 %v3174_v17, %v696_v39  ;;  %2466 = vmatmul.mubr.msk.f32.vlgmr.msra.gmra.mrb[10].mxu0 %vm807_vm3, %v735_v40  ;;  %2729 = vrsqrt.f32 %v662_v5  ;;  %v693_v21 = vmul.f32 %v2724_v48, %v3134_v15  ;;  %v2726_v63 = vpop.eup %2725  ;;  %v2650_v15 = vpack.c.bf16 %v788_v60, %v787_v57  ;;  %v805_v40 = vld [vmem:[#allocation2 + $0x1f0] sm:$0xff]  ;;  %v2101_v5 = vld [vmem:[%s3388_s9] sm:$0xff] }
 0x255   :  { %2630 = vmatpush3.bf16.msra.mxu1 %v2629_v38  ;;  %2645 = vmatpush3.bf16.msra.mxu0 %v2644_v27  ;;  %v713_v45 = vmul.f32 %v3174_v17, %v690_v4  ;;  %v692_v23 = vmul.f32 %v2726_v63, %v3128_v54  ;;  %v2728_v8 = vpop.eup %2727  ;;  %v2653_v54 = vpack.c.bf16 %v790_v7, %v789_v2 }
 0x256   :  { %2637 = vmatprep.subr.bf16.mxu1 %v2783_v42  ;;  %2646 = vmatprep.subr.bf16.mxu0 %v2783_v42  ;;  %v3257_v52 = vadd.f32 %v3180_v32, %v719_v12  ;;  %v716_v6 = vmul.f32 %v3174_v17, %v693_v21  ;;  %v695_v58 = vmul.f32 %v2728_v8, %v3146_v31 }
 0x257   :  { %2487 = vmatprep.mubr.msk.f32.mxu0 %vm2784_vm2, %v2785_v55  ;;  %v736_v49 = vadd.f32 %v3180_v32, %v713_v45  ;;  %v715_v59 = vmul.f32 %v3174_v17, %v692_v23  ;;  %v2662_v31 = vpack.c.bf16 %v796_v19, %v795_v13  ;;  %v2674_v9 = vpack.c.bf16 %v804_v37, %v803_v36 }
 0x258   :  { %2455 = vmatmul.mubr.msk.f32.vlgmr.msra.gmra.mrb[8].mxu1 %vm807_vm3, %v734_v44  ;;  %v739_v14 = vadd.f32 %v3180_v32, %v716_v6  ;;  %v718_v38 = vmul.f32 %v3174_v17, %v695_v58 }
 0x259   :  { %2639 = vmatpush3.bf16.msra.mxu1 %v2638_v18  ;;  %2648 = vmatpush3.bf16.msra.mxu0 %v2647_v47  ;;  %v738_v29 = vadd.f32 %v3180_v32, %v715_v59  ;;  %v2018_v18 = vld [vmem:[%s3386_s7 + $0x10] sm:$0xff]  ;;  %v2102_v47 = vld [vmem:[%s3388_s9 + $0x8] sm:$0xff] }
 0x25a   :  { %2640 = vmatprep.subr.bf16.mxu1 %v2783_v42  ;;  %2655 = vmatprep.subr.bf16.mxu0 %v2783_v42  ;;  %v2686_v43 = vpack.c.bf16 %v2102_v47, %v2101_v5  ;;  %v2240_v5 = vld [vmem:[%s3385_s6] ss:$0 sm:$0xff] }
 0x25b   :  { %2476 = vmatprep.mubr.msk.f32.mxu1 %vm2784_vm2, %v2785_v55 }
 0x25c   :  { %2488 = vmatmul.mubr.msk.f32.vlgmr.msra.gmra.mrb[12].mxu0 %vm807_vm3, %v737_v30 }
 0x25d   :  { %2642 = vmatpush3.bf16.msra.mxu1 %v2641_v53  ;;  %2657 = vmatpush3.bf16.msra.mxu0 %v2656_v56 }
 0x25e   :  { %2649 = vmatprep.subr.bf16.mxu1 %v2783_v42  ;;  %2658 = vmatprep.subr.bf16.mxu0 %v2783_v42  ;;  %v2730_v26 = vpop.eup %2729 }
 0x25f   :  { %2509 = vmatprep.mubr.msk.f32.mxu0 %vm2784_vm2, %v2785_v55  ;;  %v694_v27 = vmul.f32 %v2730_v26, %v3140_v0  ;;  %v741_v0 = vadd.f32 %v3180_v32, %v718_v38 }
 0x260   :  { %2477 = vmatmul.mubr.msk.f32.vlgmr.msra.gmra.mrb[10].mxu1 %vm807_vm3, %v736_v49 }
 0x261   :  { %2651 = vmatpush3.bf16.msra.mxu1 %v2650_v15  ;;  %2660 = vmatpush3.bf16.msra.mxu0 %v2659_v1  ;;  %v717_v35 = vmul.f32 %v3174_v17, %v694_v27  ;;  %v2677_v17 = vpack.c.bf16 %v806_v41, %v805_v40 }
 0x262   :  { %2652 = vmatprep.subr.bf16.mxu1 %v2783_v42  ;;  %2667 = vmatprep.subr.bf16.mxu0 %v2783_v42 }
 0x263   :  { %2498 = vmatprep.mubr.msk.f32.mxu1 %vm2784_vm2, %v2785_v55  ;;  %v740_v39 = vadd.f32 %v3180_v32, %v717_v35  ;;  %v2016_v32 = vld [vmem:[%s3386_s7] sm:$0xff] }
 0x264   :  { %2510 = vmatmul.mubr.msk.f32.vlgmr.msra.gmra.mrb[14].mxu0 %vm807_vm3, %v739_v14  ;;  %v2680_v12 = vpack.c.bf16 %v2017_v11, %v2016_v32 }
 0x265   :  { %2654 = vmatpush3.bf16.msra.mxu1 %v2653_v54  ;;  %2669 = vmatpush3.bf16.msra.mxu0 %v2668_v10 }
 0x266   :  { %2661 = vmatprep.subr.bf16.mxu1 %v2783_v42  ;;  %2670 = vmatprep.subr.bf16.mxu0 %v2783_v42 }
 0x267   :  { %2531 = vmatprep.mubr.msk.f32.mxu0 %vm2784_vm2, %v2785_v55 }
 0x268   :  { %2499 = vmatmul.mubr.msk.f32.vlgmr.msra.gmra.mrb[12].mxu1 %vm807_vm3, %v738_v29 }
 0x269   :  { %2663 = vmatpush3.bf16.msra.mxu1 %v2662_v31  ;;  %2672 = vmatpush3.bf16.msra.mxu0 %v2671_v34 }
 0x26a   :  { %2664 = vmatprep.subr.bf16.mxu1 %v2783_v42  ;;  %2520 = vmatprep.mubr.msk.f32.mxu1 %vm2784_vm2, %v2785_v55 }
 0x26b   :  { %2679 = vmatprep.subr.bf16.mxu0 %v2783_v42 }
 0x26c   :  { %2532 = vmatmul.mubr.msk.f32.vlgmr.msra.gmra.mrb[16].mxu0 %vm807_vm3, %v741_v0 }
 0x26d   :  { %2666 = vmatpush3.bf16.msra.mxu1 %v2665_v22  ;;  %2553 = vmatprep.mubr.msk.f32.mxu0 %vm2784_vm2, %v2785_v55 }
 0x26e   :  { %2673 = vmatprep.subr.bf16.mxu1 %v2783_v42  ;;  %2681 = vmatpush3.bf16.msra.mxu0 %v2680_v12 }
 0x26f   :  { %2682 = vmatprep.subr.bf16.mxu0 %v2783_v42 }
 0x270   :  { %2521 = vmatmul.mubr.msk.f32.vlgmr.msra.gmra.mrb[14].mxu1 %vm807_vm3, %v740_v39 }
 0x271   :  { %2675 = vmatpush3.bf16.msra.mxu1 %v2674_v9  ;;  %2542 = vmatprep.mubr.msk.f32.mxu1 %vm2784_vm2, %v2785_v55 }
 0x272   :  { %2676 = vmatprep.subr.bf16.mxu1 %v2783_v42 }
 0x275   :  { %2678 = vmatpush3.bf16.msra.mxu1 %v2677_v17 }
 0x276   :  { %2685 = vmatprep.subr.bf16.mxu1 %v2783_v42 }
 0x278   :  { %2543 = vmatmul.mubr.msk.f32.vlgmr.msra.gmra.mrb[16].mxu1 %vm807_vm3, %v3257_v52 }
 0x279   :  { %2564 = vmatprep.mubr.msk.f32.mxu1 %vm2784_vm2, %v2785_v55  ;;  %v2019_v55 = vld [vmem:[%s3386_s7 + $0x18] sm:$0xff]  ;;  %2687 = vmatpush3.bf16.msra.mxu1 %v2686_v43 }
 0x27a   :  { %v2683_v4 = vpack.c.bf16 %v2019_v55, %v2018_v18  ;;  %2688 = vmatprep.subr.bf16.mxu1 %v2783_v42 }
 0x27c   :  { %2684 = vmatpush3.bf16.msra.mxu0 %v2683_v4 }
 0x30b   :  { %v877_v44 = vpop.f32.mrb[0].mxu1 }
 0x30c   :  { %v2379_v46 = vpop.f32.mrb[1].mxu1  ;;  %v1976_v52 = vsel %vm487_vm1, %v877_v44, 0.0 }
 0x30f   :  { %v1023_v33 = vpop.f32.mrb[4].mxu0 }
 0x310   :  { %v2401_v50 = vpop.f32.mrb[5].mxu0  ;;  %v1979_v57 = vsel %vm487_vm1, %v1023_v33, 0.0  ;;  %v2103_v33 = vld [vmem:[%s3388_s9 + $0x10] sm:$0xff] }
 0x311   :  { %v2104_v50 = vld [vmem:[%s3388_s9 + $0x18] sm:$0xff]  ;;  %s2753_s9 = scalar_lea.vmem %s2194_s2, 32 }
 0x312   :  { %p2754_p8 = scmp.ne.s32.totalorder %s2194_s2, %s2753_s9  ;;  %p2759_p10 = scmp.lt.s32.totalorder %s2753_s9, %s2753_s9 }
 0x313   :  { %v950_v51 = vpop.f32.mrb[2].mxu1 }
 0x314   :  { %v1977_v48 = vsel %vm487_vm1, %v950_v51, 0.0  ;;  %v2390_v53 = vpop.f32.mrb[3].mxu1  ;;  %v2689_v51 = vpack.c.bf16 %v2104_v50, %v2103_v33  ;;  %p2760_p11 = por %p2759_p10, %p2758_p9 }
 0x315   :  { %v1978_v56 = vadd.f32 %v1977_v48, %v1976_v52  ;;  %v2241_v52 = vld [vmem:[%s3387_s8] ss:$0 sm:$0xff] }
 0x316   :  { %2690 = vmatpush3.bf16.msra.mxu1 %v2689_v51  ;;  %p2761_p12 = pnand %p2760_p11, %p2754_p8 }
 0x317   :  { %v1169_v21 = vpop.f32.mrb[6].mxu0  ;;  %v1980_v30 = vadd.f32 %v1979_v57, %v1978_v56 }
 0x318   :  { %v2423_v45 = vpop.f32.mrb[7].mxu0  ;;  %v1983_v63 = vsel %vm487_vm1, %v1169_v21, 0.0  ;;  %v2243_v21 = vld [vmem:[%s3389_s10] ss:$0 sm:$0xff] }
 0x31b   :  { %v1096_v60 = vpop.f32.mrb[4].mxu1 }
 0x31c   :  { %v1981_v28 = vsel %vm487_vm1, %v1096_v60, 0.0  ;;  %v2412_v42 = vpop.f32.mrb[5].mxu1 }
 0x31d   :  { %v1982_v62 = vadd.f32 %v1981_v28, %v1980_v30 }
 0x31f   :  { %v1315_v15 = vpop.f32.mrb[8].mxu0  ;;  %v1984_v1 = vadd.f32 %v1983_v63, %v1982_v62 }
 0x320   :  { %v2445_v2 = vpop.f32.mrb[9].mxu0  ;;  %v1987_v24 = vsel %vm487_vm1, %v1315_v15, 0.0 }
 0x323   :  { %v1242_v23 = vpop.f32.mrb[6].mxu1 }
 0x324   :  { %v1985_v49 = vsel %vm487_vm1, %v1242_v23, 0.0  ;;  %v2434_v6 = vpop.f32.mrb[7].mxu1 }
 0x325   :  { %v1986_v7 = vadd.f32 %v1985_v49, %v1984_v1 }
 0x327   :  { %v1461_v61 = vpop.f32.mrb[10].mxu0  ;;  %v1988_v8 = vadd.f32 %v1987_v24, %v1986_v7 }
 0x328   :  { %v2467_v54 = vpop.f32.mrb[11].mxu0  ;;  %v1991_v59 = vsel %vm487_vm1, %v1461_v61, 0.0 }
 0x32b   :  { %v1388_v10 = vpop.f32.mrb[8].mxu1 }
 0x32c   :  { %v1989_v13 = vsel %vm487_vm1, %v1388_v10, 0.0  ;;  %v2456_v58 = vpop.f32.mrb[9].mxu1 }
 0x32d   :  { %v1990_v14 = vadd.f32 %v1989_v13, %v1988_v8 }
 0x32f   :  { %v1607_v19 = vpop.f32.mrb[12].mxu0  ;;  %v1992_v20 = vadd.f32 %v1991_v59, %v1990_v14 }
 0x330   :  { %v2489_v25 = vpop.f32.mrb[13].mxu0  ;;  %v1995_v27 = vsel %vm487_vm1, %v1607_v19, 0.0 }
 0x333   :  { %v1534_v26 = vpop.f32.mrb[10].mxu1 }
 0x334   :  { %v1993_v31 = vsel %vm487_vm1, %v1534_v26, 0.0  ;;  %v2478_v34 = vpop.f32.mrb[11].mxu1 }
 0x335   :  { %v1994_v38 = vadd.f32 %v1993_v31, %v1992_v20 }
 0x337   :  { %v1753_v29 = vpop.f32.mrb[14].mxu0  ;;  %v1996_v3 = vadd.f32 %v1995_v27, %v1994_v38 }
 0x338   :  { %v2511_v16 = vpop.f32.mrb[15].mxu0  ;;  %v1999_v37 = vsel %vm487_vm1, %v1753_v29, 0.0 }
 0x33b   :  { %v1680_v22 = vpop.f32.mrb[12].mxu1 }
 0x33c   :  { %v1997_v0 = vsel %vm487_vm1, %v1680_v22, 0.0  ;;  %v2500_v35 = vpop.f32.mrb[13].mxu1 }
 0x33d   :  { %v1998_v36 = vadd.f32 %v1997_v0, %v1996_v3 }
 0x33f   :  { %v1899_v9 = vpop.f32.mrb[16].mxu0  ;;  %v2000_v39 = vadd.f32 %v1999_v37, %v1998_v36 }
 0x340   :  { %v2533_v40 = vpop.f32.mrb[17].mxu0  ;;  %v2003_v12 = vsel %vm487_vm1, %v1899_v9, 0.0 }
 0x343   :  { %v1826_v41 = vpop.f32.mrb[14].mxu1 }
 0x344   :  { %v2001_v17 = vsel %vm487_vm1, %v1826_v41, 0.0  ;;  %v2522_v32 = vpop.f32.mrb[15].mxu1 }
 0x345   :  { %v2002_v11 = vadd.f32 %v2001_v17, %v2000_v39 }
 0x347   :  { %v2004_v18 = vadd.f32 %v2003_v12, %v2002_v11 }
 0x34b   :  { %v1972_v55 = vpop.f32.mrb[16].mxu1 }
 0x34c   :  { %v2005_v4 = vsel %vm487_vm1, %v1972_v55, 0.0  ;;  %v2544_v47 = vpop.f32.mrb[17].mxu1 }
 0x34d   :  { %v2006_v43 = vadd.f32 %v2005_v4, %v2004_v18 }
 0x34f   :  { %v2014_v44 = vadd.f32 %v2240_v5, %v2006_v43 }
 0x351   :  { %v2015_v46 = vmax.f32 %v2014_v44, 0.0 }
 0x353   :  { %2554 = vmatmul.mubr.msk.f32.vlgmr.msra.gmra.mrb[18].mxu0 %vm807_vm3, %v2015_v46 }
 0x426   :  { %v2096_v48 = vpop.f32.mrb[18].mxu0 }
 0x427   :  { %v2097_v53 = vadd.f32 %v2241_v52, %v2096_v48  ;;  %v2555_v56 = vpop.f32.mrb[19].mxu0 }
 0x429   :  { %v2100_v57 = vmax.f32 %v2097_v53, 0.0 }
 0x42b   :  { %2565 = vmatmul.mubr.msk.f32.vlgmr.msra.gmra.mrb[18].mxu1 %vm807_vm3, %v2100_v57 }
 0x4fe   :  { %v2181_v30 = vpop.f32.mrb[18].mxu1 }
 0x4ff   :  { %v2182_v45 = vadd.f32 %v2243_v21, %v2181_v30  ;;  %v2566_v60 = vpop.f32.mrb[19].mxu1 }
 0x501   :  { %2186 = vst.msk [vmem:[#allocation5] sm:$0x3] %vm2185_vm4, %v2182_v45 }
 0x502   :  { %2764 = shalt.err (!%p2761_p12)
}
 0x503   :  { %s2765_s27 = scalar_lea.hbm %s3390_s11, 32 }
 0x504   :  { %p2766_p13 = scmp.ne.s32.totalorder %s3390_s11, %s2765_s27  ;;  %p2769_p0 = scmp.lt.u32.totalorder %s2765_s27, %s3390_s11 }
 0x506   :  { %p2771_p1 = pnand %p2769_p0, %p2766_p13 }
 0x508   :  { %2774 = shalt.err (!%p2771_p1)
}
 0x509   :  { %2196 = dma.vmem_to_hbm [thread:$0]  %s2194_s2, 32, %s3390_s11, [#allocation4]  }
 0x50a   :  { %2777 = dma.done.wait [#allocation4], 32  }
 0x50b   :  { %2778 = vsyncadd [#allocation4], 4294967264 }
 0x50c   :  { %2200 = vsyncpa [#allocation3], 1 }
 0x50d   :  { %2201 = vsyncpa [#allocation4], 1 }

</bundles_post_ra>
